<compile_context>
chip_gen: v5e
topology: v5e:2x2
jax: 0.10.0
libtpu: 0.0.40
codegen_flags: <defaults>
</compile_context>

<pallas_src>
import functools

import numpy as np
import jax
import jax.numpy as jnp
from jax import lax
from jax.experimental import pallas as pl
from jax.experimental.pallas import tpu as pltpu

KSIZE = 3
STRIDE = 2
PADDING = 1
OUTPUT_PADDING = 1
NEG_SLOPE = 0.01      # torch.nn.LeakyReLU() default
BN_EPS = 1e-5         # torch.nn.BatchNorm2d default


# --------------------------------------------------------------------------
# VMEM budgets derived from the actual chip (v7x: 64 MiB, v5e/v6e: 128 MiB).
# --------------------------------------------------------------------------
def _vmem_budgets():
    cap = None
    try:
        cap = getattr(pltpu.get_tpu_info(), "vmem_capacity_bytes", None)
    except Exception:
        cap = None
    if not cap:
        cap = 64 * 1024 * 1024                       # conservative (v7x per-TC)
    vmem_limit = int(min(cap * 3 // 4, 96 * 1024 * 1024))   # 48 MiB v7x / 96 MiB v5e,v6e
    budget = int(min(cap // 2, 64 * 1024 * 1024))            # 32 MiB v7x / 64 MiB v5e,v6e
    return budget, vmem_limit


# --------------------------------------------------------------------------
# Kernel: sub-pixel transposed conv + bias + LeakyReLU + BN partial statistics.
# --------------------------------------------------------------------------
def _convT_lrelu_kernel(x_ref, halo_ref, w_ref, b_ref, o_ref, stats_ref, *, split_k):
    # x_ref   : (1, TH, W, Cin)  input rows [r0, r0+TH)
    # halo_ref: (1, 1,  W, Cin)  input row r0+TH (first row of the next tile;
    #                            clamped/garbage on the last tile -> zeroed here)
    # w_ref   : (4*Cin, 4*Cout)  packed sub-pixel weight
    # b_ref   : (1, 4*Cout)      bias replicated over the 4 output parities (f32)
    # o_ref   : (TH*W, 4*Cout)   conv + LeakyReLU output, parity-major lanes
    # stats   : (1, 2, 4*Cout)   per-tile [sum, sum_sq] partials (f32)
    th, w, cin = x_ref.shape[1], x_ref.shape[2], x_ref.shape[3]
    cols = w_ref.shape[1]
    rows = th * w

    x00 = x_ref[0]                                      # x[r, c]     (TH, W, Cin)

    # 1-row halo; zero it on the last row-tile of the image (exact scalar multiply).
    keep = (pl.program_id(1) != pl.num_programs(1) - 1).astype(x00.dtype)
    hrow = halo_ref[0] * keep                           # (1, W, Cin)

    if th > 1:
        x10 = jnp.concatenate([x00[1:], hrow], axis=0)  # x[r+1, c]
    else:
        x10 = hrow

    # Column-shifted taps x[., c+1] (zero past the right edge).
    zcol = jnp.zeros((th, 1, cin), x00.dtype)
    x01 = jnp.concatenate([x00[:, 1:, :], zcol], axis=1)
    x11 = jnp.concatenate([x10[:, 1:, :], zcol], axis=1)

    if split_k:
        # Cin multiple of 128: 4 accumulated MXU matmuls, no im2col copy,
        # MXU-aligned contraction.  (On v7x the chain accumulates in the MRB.)
        acc = jnp.dot(x00.reshape(rows, cin), w_ref[0:cin, :],
                      preferred_element_type=jnp.float32)
        acc = acc + jnp.dot(x01.reshape(rows, cin), w_ref[cin:2 * cin, :],
                            preferred_element_type=jnp.float32)
        acc = acc + jnp.dot(x10.reshape(rows, cin), w_ref[2 * cin:3 * cin, :],
                            preferred_element_type=jnp.float32)
        acc = acc + jnp.dot(x11.reshape(rows, cin), w_ref[3 * cin:4 * cin, :],
                            preferred_element_type=jnp.float32)
    else:
        # Small Cin (memory-bound regime): one packed matmul, contraction 4*Cin.
        patches = jnp.concatenate([x00, x01, x10, x11], axis=-1)    # (TH, W, 4*Cin)
        acc = jnp.dot(patches.reshape(rows, 4 * cin), w_ref[...],
                      preferred_element_type=jnp.float32)

    acc = acc + b_ref[...]                                          # (rows, 4*Cout) f32
    act = jnp.where(acc >= 0, acc, NEG_SLOPE * acc)                 # LeakyReLU(0.01)
    act_store = act.astype(o_ref.dtype)

    # Fused BN partial statistics, computed on the STORED (rounded) values so the
    # later normalize matches exactly what was written.
    act32 = act_store.astype(jnp.float32)
    s = jnp.sum(act32, axis=0, keepdims=True)
    sq = jnp.sum(act32 * act32, axis=0, keepdims=True)
    stats_ref[...] = jnp.concatenate([s, sq], axis=0).reshape(1, 2, cols)

    # Store as-is: parity interleave is folded into the single mandatory NCHW
    # transform outside (fused with BN apply by XLA).
    o_ref[...] = act_store


# --------------------------------------------------------------------------
# Row-tile picker with full working-set accounting (pipeline buffers + in-kernel
# temporaries), megacore/v7x-aware.
# --------------------------------------------------------------------------
def _pick_conv_row_tile(N, H, W, Cin, Cout, in_dtype, out_dtype, sub,
                        budget_bytes, split_k):
    in_sz = jnp.dtype(in_dtype).itemsize
    out_sz = jnp.dtype(out_dtype).itemsize
    cols = 4 * Cout

    def ok(t):
        if H % t:
            return False
        rows = t * W
        return rows % sub == 0 or (N == 1 and t == H)

    def step_bytes(t):
        rows = t * W
        # Pallas-pipelined blocks (double-buffered).
        dma = 2 * (t * W * Cin * in_sz           # x row tile
                   + W * Cin * in_sz             # halo row
                   + rows * cols * out_sz        # conv output tile
                   + 2 * cols * 4                # stats tile
                   + 4 * Cin * cols * in_sz      # packed weight
                   + cols * 4)                   # bias row
        # In-kernel temporaries (single copies).
        tmp = 3 * t * W * Cin * in_sz            # x01 / x10 / x11
        if not split_k:
            tmp += rows * 4 * Cin * in_sz        # im2col patches
        tmp += 2 * rows * cols * 4               # f32 acc + LeakyReLU temp
        tmp += rows * cols * out_sz              # cast-to-store copy
        return dma + tmp

    valid = [t for t in range(1, H + 1) if ok(t)]
    if not valid:
        valid = [H]
    fitting = [t for t in valid if step_bytes(t) <= budget_bytes]
    if not fitting:
        return min(valid)
    # Keep both v7x TensorCores / megacore halves busy: prefer >= 4 grid steps.
    preferred = [t for t in fitting if N * (H // t) >= 4]
    return max(preferred) if preferred else max(fitting)


# --------------------------------------------------------------------------
# Forward pass
# --------------------------------------------------------------------------
def upscale_unit_forward(x_nchw, wt, conv_bias, gamma, beta, *,
                         compute_dtype=jnp.float32, conv_store_dtype=None,
                         row_tile=None):
    """x_nchw: (N, Cin, H, W); wt: ConvTranspose2d weight (Cin, Cout, K, K)."""
    N, Cin, H, W = x_nchw.shape
    Cout = wt.shape[1]
    OH, OW = 2 * H, 2 * W          # (H-1)*2 - 2*1 + 3 + 1 = 2H  (same for W)
    if conv_store_dtype is None:
        # TODO(synk): default to bf16 when tolerances allow -- halves the
        # intermediate activation HBM traffic.
        conv_store_dtype = compute_dtype
    split_k = (Cin % 128 == 0)

    budget_bytes, vmem_limit = _vmem_budgets()
    sub = 8 if jnp.dtype(conv_store_dtype).itemsize >= 4 else 16
    if row_tile is not None:
        th = int(row_tile)
        assert H % th == 0 and ((th * W) % sub == 0 or (N == 1 and th == H)), \
            (th, H, W, sub)
    else:
        th = _pick_conv_row_tile(N, H, W, Cin, Cout, compute_dtype,
                                 conv_store_dtype, sub, budget_bytes, split_k)
    n_tiles = H // th

    # Input glue: NCHW -> NHWC + cast (one small pass over the input).
    x = jnp.transpose(x_nchw, (0, 2, 3, 1)).astype(compute_dtype)   # (N, H, W, Cin)

    # Packed sub-pixel weight (4*Cin, 4*Cout).  Column groups = output parity
    # (ee, eo, oe, oo); row groups = taps (x[r,c], x[r,c+1], x[r+1,c], x[r+1,c+1]).
    wf = jnp.transpose(wt[:, :, ::-1, ::-1], (2, 3, 0, 1)).astype(jnp.float32)
    z = jnp.zeros((Cin, Cout), jnp.float32)
    w_big = jnp.concatenate([
        jnp.concatenate([wf[1, 1], wf[1, 0], wf[0, 1], wf[0, 0]], axis=1),
        jnp.concatenate([z,        wf[1, 2], z,        wf[0, 2]], axis=1),
        jnp.concatenate([z,        z,        wf[2, 1], wf[2, 0]], axis=1),
        jnp.concatenate([z,        z,        z,        wf[2, 2]], axis=1),
    ], axis=0).astype(compute_dtype)                                 # (4Cin, 4Cout)
    bias4 = jnp.tile(conv_bias.astype(jnp.float32), 4).reshape(1, 4 * Cout)

    in_sz = jnp.dtype(compute_dtype).itemsize
    out_sz = jnp.dtype(conv_store_dtype).itemsize
    cost = pl.CostEstimate(
        flops=int(2 * N * H * W * 4 * Cin * 4 * Cout + 8 * N * H * W * 4 * Cout),
        transcendentals=0,
        bytes_accessed=int(N * H * W * Cin * in_sz
                           + N * n_tiles * W * Cin * in_sz
                           + 4 * Cin * 4 * Cout * in_sz + 4 * Cout * 4
                           + N * H * W * 4 * Cout * out_sz
                           + N * n_tiles * 2 * 4 * Cout * 4))

    kernel = functools.partial(_convT_lrelu_kernel, split_k=split_k)

    conv_out, stats = pl.pallas_call(
        kernel,
        out_shape=(
            jax.ShapeDtypeStruct((N * H * W, 4 * Cout), conv_store_dtype),
            jax.ShapeDtypeStruct((N * n_tiles, 2, 4 * Cout), jnp.float32),
        ),
        grid_spec=pltpu.PrefetchScalarGridSpec(
            num_scalar_prefetch=0,
            grid=(N, n_tiles),
            in_specs=[
                pl.BlockSpec((1, th, W, Cin), lambda n, t: (n, t, 0, 0)),
                # 1-row halo = first row of the next tile (clamped at the image
                # edge; zeroed in-kernel on the last tile).  Replaces the previous
                # full-size x_nxt duplicate; the input is passed twice but the
                # second operand only DMAs one row per step.
                pl.BlockSpec((1, 1, W, Cin),
                             lambda n, t: (n, jnp.minimum((t + 1) * th, H - 1), 0, 0)),
                pl.BlockSpec((4 * Cin, 4 * Cout), lambda n, t: (0, 0)),
                pl.BlockSpec((1, 4 * Cout), lambda n, t: (0, 0)),
            ],
            out_specs=(
                pl.BlockSpec((th * W, 4 * Cout), lambda n, t: (n * n_tiles + t, 0)),
                pl.BlockSpec((1, 2, 4 * Cout), lambda n, t: (n * n_tiles + t, 0, 0)),
            ),
        ),
        compiler_params=pltpu.CompilerParams(
            dimension_semantics=("parallel", "parallel"),   # megacore / v7x 2-TC
            vmem_limit_bytes=vmem_limit),
        cost_estimate=cost,
    )(x, x, w_big, bias4)

    # Tiny (Cout-sized) finalize of the fused BN statistics in plain JAX.
    count = float(N * OH * OW)
    tot = jnp.sum(stats, axis=0).reshape(2, 4, Cout).sum(axis=1)     # (2, Cout)
    mean = tot[0] / count
    var = jnp.maximum(tot[1] / count - mean * mean, 0.0)             # biased variance
    inv_std = lax.rsqrt(var + BN_EPS)
    scale = gamma.astype(jnp.float32) * inv_std
    shift = beta.astype(jnp.float32) - mean * scale
    # TODO(synk): running_mean/running_var buffer updates are not modeled.

    # BN apply + parity interleave + NCHW in ONE fused XLA pass over the activation
    # (replaces the previous standalone BN-apply pallas_call + separate transpose).
    y = conv_out.reshape(N, H, W, 2, 2, Cout).astype(jnp.float32)
    y = y * scale.reshape(1, 1, 1, 1, 1, Cout) + shift.reshape(1, 1, 1, 1, 1, Cout)
    out = jnp.transpose(y, (0, 5, 1, 3, 2, 4)).reshape(N, Cout, OH, OW)
    return out


# --------------------------------------------------------------------------
# Pure-JAX reference mirroring the PyTorch forward pass (with optional operand /
# intermediate rounding to match the low-precision Pallas path).
# --------------------------------------------------------------------------
def reference(x_nchw, wt, conv_bias, gamma, beta, *,
              compute_dtype=jnp.float32, conv_store_dtype=None):
    sd = compute_dtype if conv_store_dtype is None else conv_store_dtype
    xq = x_nchw.astype(compute_dtype).astype(jnp.float32)
    wq = wt.astype(compute_dtype).astype(jnp.float32)
    w_oihw = jnp.transpose(wq, (1, 0, 2, 3))[:, :, ::-1, ::-1]
    pad_lo = KSIZE - 1 - PADDING
    pad_hi = KSIZE - 1 - PADDING + OUTPUT_PADDING
    y = lax.conv_general_dilated(
        xq, w_oihw, window_strides=(1, 1),
        padding=((pad_lo, pad_hi), (pad_lo, pad_hi)),
        lhs_dilation=(STRIDE, STRIDE),
        dimension_numbers=("NCHW", "OIHW", "NCHW"))
    y = y + conv_bias.reshape(1, -1, 1, 1)
    y = jnp.where(y >= 0, y, NEG_SLOPE * y)
    y = y.astype(sd).astype(jnp.float32)
    mean = jnp.mean(y, axis=(0, 2, 3), keepdims=True)
    var = jnp.mean((y - mean) ** 2, axis=(0, 2, 3), keepdims=True)
    y = (y - mean) / jnp.sqrt(var + BN_EPS)
    return y * gamma.reshape(1, -1, 1, 1) + beta.reshape(1, -1, 1, 1)


if __name__ == "__main__":
    keys = jax.random.split(jax.random.PRNGKey(0), 10)

    # ---- Config A: small channels (packed single-matmul path), f32 and bf16 ----
    N, Cin, H, W, Cout = 2, 4, 16, 16, 8
    x = jax.random.normal(keys[0], (N, Cin, H, W), jnp.float32)
    bound = 1.0 / np.sqrt(Cin * KSIZE * KSIZE)
    wt = jax.random.uniform(keys[1], (Cin, Cout, KSIZE, KSIZE), jnp.float32, -bound, bound)
    conv_bias = jax.random.uniform(keys[2], (Cout,), jnp.float32, -bound, bound)
    gamma = jax.random.uniform(keys[3], (Cout,), jnp.float32, 0.5, 1.5)
    beta = jax.random.uniform(keys[4], (Cout,), jnp.float32, -0.5, 0.5)

    fwd_f32 = jax.jit(functools.partial(upscale_unit_forward, row_tile=8))
    out_f32 = jax.block_until_ready(fwd_f32(x, wt, conv_bias, gamma, beta))
    assert out_f32.shape == (N, Cout, 2 * H, 2 * W), out_f32.shape
    ref_f32 = reference(x, wt, conv_bias, gamma, beta)
    np.testing.assert_allclose(np.asarray(out_f32), np.asarray(ref_f32),
                               rtol=1e-4, atol=1e-4)

    fwd_bf16 = jax.jit(functools.partial(upscale_unit_forward,
                                         compute_dtype=jnp.bfloat16))
    out_bf16 = jax.block_until_ready(fwd_bf16(x, wt, conv_bias, gamma, beta))
    assert out_bf16.shape == (N, Cout, 2 * H, 2 * W), out_bf16.shape
    ref_bf16 = reference(x, wt, conv_bias, gamma, beta, compute_dtype=jnp.bfloat16)
    np.testing.assert_allclose(np.asarray(out_bf16), np.asarray(ref_bf16),
                               rtol=0.05, atol=0.15)

    # ---- Config B: Cin multiple of 128 (split 4-matmul path, lane-dense output) ----
    N2, Cin2, H2, W2, Cout2 = 1, 128, 8, 8, 32
    x2 = jax.random.normal(keys[5], (N2, Cin2, H2, W2), jnp.float32)
    bound2 = 1.0 / np.sqrt(Cin2 * KSIZE * KSIZE)
    wt2 = jax.random.uniform(keys[6], (Cin2, Cout2, KSIZE, KSIZE), jnp.float32,
                             -bound2, bound2)
    cb2 = jax.random.uniform(keys[7], (Cout2,), jnp.float32, -bound2, bound2)
    g2 = jax.random.uniform(keys[8], (Cout2,), jnp.float32, 0.5, 1.5)
    b2 = jax.random.uniform(keys[9], (Cout2,), jnp.float32, -0.5, 0.5)

    fwd2 = jax.jit(upscale_unit_forward)
    out2 = jax.block_until_ready(fwd2(x2, wt2, cb2, g2, b2))
    assert out2.shape == (N2, Cout2, 2 * H2, 2 * W2), out2.shape
    ref2 = reference(x2, wt2, cb2, g2, b2)
    np.testing.assert_allclose(np.asarray(out2), np.asarray(ref2),
                               rtol=1e-3, atol=1e-3)

    print("KERNEL_OK")
</pallas_src>

<mosaic_0001>
module attributes {stable_mosaic.version = 11 : i64} {
  func.func @_convT_lrelu_kernel(%arg0: i32, %arg1: i32, %arg2: memref<1x8x16x4xf32, #tpu.memory_space<vmem>>, %arg3: memref<1x1x16x4xf32, #tpu.memory_space<vmem>>, %arg4: memref<16x32xf32, #tpu.memory_space<vmem>>, %arg5: memref<1x32xf32, #tpu.memory_space<vmem>>, %arg6: memref<128x32xf32, #tpu.memory_space<vmem>>, %arg7: memref<1x2x32xf32, #tpu.memory_space<vmem>>) attributes {dimension_semantics = [#tpu.dimension_semantics<parallel>, #tpu.dimension_semantics<parallel>], iteration_bounds = array<i64: 2, 2>, scalar_prefetch = 0 : i64, scratch_operands = 0 : i64, tpu.core_type = #tpu.core_type<tc>, window_params = [{transform_indices = @transform_0, window_bounds = array<i64: 1, 8, 16, 4>}, {transform_indices = @transform_1, window_bounds = array<i64: 1, 1, 16, 4>}, {pipeline_mode = #tpu.pipeline_mode<synchronous>, transform_indices = @transform_2, window_bounds = array<i64: 16, 32>}, {pipeline_mode = #tpu.pipeline_mode<synchronous>, transform_indices = @transform_3, window_bounds = array<i64: 1, 32>}, {transform_indices = @transform_4, window_bounds = array<i64: 128, 32>}, {transform_indices = @transform_5, window_bounds = array<i64: 1, 2, 32>}]} {
    %c0 = arith.constant 0 : index
    %c0_0 = arith.constant 0 : index
    %c0_1 = arith.constant 0 : index
    %c0_2 = arith.constant 0 : index
    %0 = vector.load %arg2[%c0, %c0_0, %c0_1, %c0_2] : memref<1x8x16x4xf32, #tpu.memory_space<vmem>>, vector<1x8x16x4xf32>
    %1 = vector.shape_cast %0 : vector<1x8x16x4xf32> to vector<8x16x4xf32>
    %c1_i32 = arith.constant 1 : i32
    %2 = arith.cmpi ne, %arg1, %c1_i32 : i32
    %3 = arith.extui %2 : i1 to i32
    %4 = arith.sitofp %3 : i32 to f32
    %c0_3 = arith.constant 0 : index
    %c0_4 = arith.constant 0 : index
    %c0_5 = arith.constant 0 : index
    %c0_6 = arith.constant 0 : index
    %5 = vector.load %arg3[%c0_3, %c0_4, %c0_5, %c0_6] : memref<1x1x16x4xf32, #tpu.memory_space<vmem>>, vector<1x1x16x4xf32>
    %6 = vector.shape_cast %5 : vector<1x1x16x4xf32> to vector<1x16x4xf32>
    %7 = vector.broadcast %4 : f32 to vector<1x16x4xf32>
    %8 = arith.mulf %6, %7 : vector<1x16x4xf32>
    %9 = vector.extract_strided_slice %1 {offsets = [1, 0, 0], sizes = [7, 16, 4], strides = [1, 1, 1]} : vector<8x16x4xf32> to vector<7x16x4xf32>
    %10 = tpu.concatenate %9, %8 in 0 : vector<7x16x4xf32>, vector<1x16x4xf32> -> vector<8x16x4xf32>
    %cst = arith.constant 0.000000e+00 : f32
    %11 = vector.broadcast %cst : f32 to vector<8x1x4xf32>
    %12 = vector.extract_strided_slice %1 {offsets = [0, 1, 0], sizes = [8, 15, 4], strides = [1, 1, 1]} : vector<8x16x4xf32> to vector<8x15x4xf32>
    %13 = tpu.concatenate %12, %11 in 1 : vector<8x15x4xf32>, vector<8x1x4xf32> -> vector<8x16x4xf32>
    %14 = vector.extract_strided_slice %10 {offsets = [0, 1, 0], sizes = [8, 15, 4], strides = [1, 1, 1]} : vector<8x16x4xf32> to vector<8x15x4xf32>
    %15 = tpu.concatenate %14, %11 in 1 : vector<8x15x4xf32>, vector<8x1x4xf32> -> vector<8x16x4xf32>
    %16 = tpu.concatenate %1, %13, %10, %15 in 2 : vector<8x16x4xf32>, vector<8x16x4xf32>, vector<8x16x4xf32>, vector<8x16x4xf32> -> vector<8x16x16xf32>
    %17 = vector.shape_cast %16 : vector<8x16x16xf32> to vector<128x16xf32>
    %c0_7 = arith.constant 0 : index
    %c0_8 = arith.constant 0 : index
    %18 = vector.load %arg4[%c0_7, %c0_8] : memref<16x32xf32, #tpu.memory_space<vmem>>, vector<16x32xf32>
    %cst_9 = arith.constant dense<0.000000e+00> : vector<128x32xf32>
    %19 = tpu.matmul %17, %18, %cst_9 {dimension_numbers = #tpu.dot_dimension_numbers<[1], [0], [0], [1], [0, 0, 1, 1], [], []>} : vector<128x16xf32>, vector<16x32xf32>, vector<128x32xf32> -> vector<128x32xf32>
    %c0_10 = arith.constant 0 : index
    %c0_11 = arith.constant 0 : index
    %20 = vector.load %arg5[%c0_10, %c0_11] : memref<1x32xf32, #tpu.memory_space<vmem>>, vector<1x32xf32>
    %21 = vector.broadcast %20 : vector<1x32xf32> to vector<128x32xf32>
    %22 = arith.addf %19, %21 : vector<128x32xf32>
    %cst_12 = arith.constant 0.000000e+00 : f32
    %23 = vector.broadcast %cst_12 : f32 to vector<128x32xf32>
    %24 = arith.cmpf oge, %22, %23 : vector<128x32xf32>
    %cst_13 = arith.constant 0.00999999977 : f32
    %25 = vector.broadcast %cst_13 : f32 to vector<128x32xf32>
    %26 = arith.mulf %25, %22 : vector<128x32xf32>
    %27 = arith.select %24, %22, %26 : vector<128x32xi1>, vector<128x32xf32>
    %cst_14 = arith.constant dense<0.000000e+00> : vector<32xf32>
    %28 = vector.multi_reduction <add>, %27, %cst_14 [0] : vector<128x32xf32> to vector<32xf32>
    %29 = vector.shape_cast %28 : vector<32xf32> to vector<1x32xf32>
    %30 = arith.mulf %27, %27 : vector<128x32xf32>
    %cst_15 = arith.constant dense<0.000000e+00> : vector<32xf32>
    %31 = vector.multi_reduction <add>, %30, %cst_15 [0] : vector<128x32xf32> to vector<32xf32>
    %32 = vector.shape_cast %31 : vector<32xf32> to vector<1x32xf32>
    %33 = tpu.concatenate %29, %32 in 0 : vector<1x32xf32>, vector<1x32xf32> -> vector<2x32xf32>
    %34 = vector.shape_cast %33 : vector<2x32xf32> to vector<1x2x32xf32>
    %c0_16 = arith.constant 0 : index
    %c0_17 = arith.constant 0 : index
    %c0_18 = arith.constant 0 : index
    %35 = vector.load %arg7[%c0_16, %c0_17, %c0_18] : memref<1x2x32xf32, #tpu.memory_space<vmem>>, vector<1x2x32xf32>
    tpu.vector_store %arg7[%c0_16, %c0_17, %c0_18], %34 {strides = array<i32>} : memref<1x2x32xf32, #tpu.memory_space<vmem>>, vector<1x2x32xf32>,
    %c0_19 = arith.constant 0 : index
    %c0_20 = arith.constant 0 : index
    %36 = vector.load %arg6[%c0_19, %c0_20] : memref<128x32xf32, #tpu.memory_space<vmem>>, vector<128x32xf32>
    tpu.vector_store %arg6[%c0_19, %c0_20], %27 {strides = array<i32>} : memref<128x32xf32, #tpu.memory_space<vmem>>, vector<128x32xf32>,
    return
  }
  func.func @transform_0(%arg0: i32, %arg1: i32) -> (i32, i32, i32, i32) {
    %c0_i32 = arith.constant 0 : i32
    %c0_i32_0 = arith.constant 0 : i32
    %c0_i32_1 = arith.constant 0 : i32
    return %arg0, %arg1, %c0_i32, %c0_i32_0 : i32, i32, i32, i32
  }
  func.func @transform_1(%arg0: i32, %arg1: i32) -> (i32, i32, i32, i32) {
    %c1_i32 = arith.constant 1 : i32
    %0 = arith.addi %arg1, %c1_i32 : i32
    %c8_i32 = arith.constant 8 : i32
    %1 = arith.muli %0, %c8_i32 : i32
    %c15_i32 = arith.constant 15 : i32
    %2 = arith.minsi %1, %c15_i32 : i32
    %c0_i32 = arith.constant 0 : i32
    %c0_i32_0 = arith.constant 0 : i32
    %c0_i32_1 = arith.constant 0 : i32
    return %arg0, %2, %c0_i32, %c0_i32_0 : i32, i32, i32, i32
  }
  func.func @transform_2(%arg0: i32, %arg1: i32) -> (i32, i32) {
    %c0_i32 = arith.constant 0 : i32
    %c0_i32_0 = arith.constant 0 : i32
    %c0_i32_1 = arith.constant 0 : i32
    return %c0_i32, %c0_i32_0 : i32, i32
  }
  func.func @transform_3(%arg0: i32, %arg1: i32) -> (i32, i32) {
    %c0_i32 = arith.constant 0 : i32
    %c0_i32_0 = arith.constant 0 : i32
    %c0_i32_1 = arith.constant 0 : i32
    return %c0_i32, %c0_i32_0 : i32, i32
  }
  func.func @transform_4(%arg0: i32, %arg1: i32) -> (i32, i32) {
    %c2_i32 = arith.constant 2 : i32
    %0 = arith.muli %arg0, %c2_i32 : i32
    %1 = arith.addi %0, %arg1 : i32
    %c0_i32 = arith.constant 0 : i32
    %c0_i32_0 = arith.constant 0 : i32
    return %1, %c0_i32 : i32, i32
  }
  func.func @transform_5(%arg0: i32, %arg1: i32) -> (i32, i32, i32) {
    %c2_i32 = arith.constant 2 : i32
    %0 = arith.muli %arg0, %c2_i32 : i32
    %1 = arith.addi %0, %arg1 : i32
    %c0_i32 = arith.constant 0 : i32
    %c0_i32_0 = arith.constant 0 : i32
    %c0_i32_1 = arith.constant 0 : i32
    return %1, %c0_i32, %c0_i32_0 : i32, i32, i32
  }
}

</mosaic_0001>

<bundles_post_ra>
// kernel: tile.9
= control target key start
LH: loop header
LB: loop body
LE: loop exit
PB: predicated region body
PF: predicated region fallthrough
CT: control target
= control target key end

     0   :  { %s37_s8 = smov 8   ;;  %s38_s9 = smov 16   ;;  %vm7_vm0 = vcmask 64512   ;;  %vm13_vm1 = vcmask 261312   ;;  %vm19_vm2 = vcmask 195712   ;;  %vm25_vm3 = vcmask 130112   ;;  %s55_s0 = inlined_call_operand.vmem [shape: f32[4,8], index: 0, kind: input, shape index: {}]   ;;  %s56_s1 = inlined_call_operand.vmem [shape: f32[1,32], index: 1, kind: output, shape index: {}]  }
   0x1   :  { %v4_v0 = vld [vmem:[%s55_s0] sm:$0xf]  ;;  %s36_s0 = smov 24  }
   0x2   :  { %5 = vst [vmem:[#allocation1] sm:$0xf] %v4_v0 }
   0x9   :  { %v10_v1 = vld [vmem:[#allocation1 + $0x3] sm:$0x1]   ;;  %v22_v2 = vld [vmem:[#allocation1 + $0x1] sm:$0x1]   ;;  %v16_v3 = vld [vmem:[#allocation1 + $0x2] sm:$0x1]  }
   0xa   :  { %11 = vrot.lane.b32.xlu0 %v10_v1, %s36_s0  ;;  %23 = vrot.lane.b32.xlu1 %v22_v2, %s37_s8  ;;  %v6_v4 = vld [vmem:[#allocation1] sm:$0x1]  }
   0xb   :  { %8 = vst.msk [vmem:[#allocation0] sm:$0x1] %vm7_vm0, %v6_v4  }
  0x12   :  { %17 = vrot.lane.b32.xlu0 %v16_v3, %s38_s9 }
  0x7c   :  { %v12_v5 = vpop.permute.xlu0 %11   ;;  %v24_v6 = vpop.permute.xlu1 %23  }
  0x7d   :  { %14 = vst.msk [vmem:[#allocation0] sm:$0x1] %vm13_vm1, %v12_v5  }
  0x84   :  { %v18_v7 = vpop.permute.xlu0 %17  }
  0x85   :  { %20 = vst.msk [vmem:[#allocation0] sm:$0x1] %vm19_vm2, %v18_v7  }
  0x86   :  { %26 = vst.msk [vmem:[#allocation0] sm:$0x1] %vm25_vm3, %v24_v6  }
  0x8d   :  { %v29_v8 = vld [vmem:[#allocation0] sm:$0x1] }
  0x8e   :  { %32 = vst [vmem:[%s56_s1] sm:$0x1] %v29_v8 }

// kernel: tile.8
= control target key start
LH: loop header
LB: loop body
LE: loop exit
PB: predicated region body
PF: predicated region fallthrough
CT: control target
= control target key end

     0   :  { %s22_s0 = inlined_call_operand.vmem [shape: f32[8], index: 0, kind: input, shape index: {}]   ;;  %s23_s1 = inlined_call_operand.vmem [shape: f32[4,8], index: 1, kind: output, shape index: {}]  }
   0x1   :  { %v4_v0 = vld [vmem:[%s22_s0] ss:$0 sm:$0xff] }
   0x2   :  { %5 = vst [vmem:[%s23_s1] sm:$0xf] %v4_v0 }

// kernel: upscale_unit_forward.1
= control target key start
LH: loop header
LB: loop body
LE: loop exit
PB: predicated region body
PF: predicated region fallthrough
CT: control target
= control target key end

     0   :  { %s1236_s18 = smov 0   ;;  %s1238_s19 = smov 0   ;;  %s1669_s0 = inlined_call_operand.vmem [shape: f32[2,16,16,4], index: 0, kind: input, shape index: {}, may-alias: {0,1}]   ;;  %s1670_s1 = inlined_call_operand.vmem [shape: f32[2,16,16,4], index: 1, kind: input, shape index: {}, may-alias: {0,1}]   ;;  %s1671_s2 = inlined_call_operand.vmem [shape: f32[16,32], index: 2, kind: input, shape index: {}]   ;;  %s1672_s3 = inlined_call_operand.vmem [shape: f32[1,32], index: 3, kind: input, shape index: {}]   ;;  %s1673_s4 = inlined_call_operand.vmem [shape: f32[512,32], index: 4, kind: output, shape index: {0}]   ;;  %s1674_s5 = inlined_call_operand.vmem [shape: f32[4,2,32], index: 5, kind: output, shape index: {1}]  }
   0x1   :  { %s1240_s20 = smov 0   ;;  %s1242_s21 = smov 0  }
   0x2   :  { %s1244_s22 = smov 0  }
   0x3 LB: > { %s25_s23 = sadd.s32 1, %s1193_s20  ;;  %s28_s24 = sadd.s32 1, %s1197_s21  ;;  %s1201_s22 = sphi %s1244_s22, %s16_s22   ;;  %s1197_s21 = sphi %s1242_s21, %s1679_s21   ;;  %s1193_s20 = sphi %s1240_s20, %s1678_s20   ;;  %s1189_s19 = sphi %s1238_s19, %s1677_s19   ;;  %s1185_s18 = sphi %s1236_s18, %s1676_s18  }
   0x4   : > { %p26_p0 = scmp.ge.s32.totalorder %s25_s23, 2  ;;  %p1072_p1 = scmp.ge.s32.totalorder %s1201_s22, 1 }
   0x5   : > { %p250_p2 = scmp.lt.s32.totalorder %s1201_s22, 5 }
   0x6   : > { %s1681_s23 = smov (%p26_p0, %s25_s23), 0  ;;  %s1683_s24 = smov (!%p26_p0, %s28_s24), %s1197_s21 }
   0x7   : > { %p251_p3 = pnand %p1072_p1, %p250_p2  ;;  %p30_p4 = scmp.ge.s32.totalorder %s1683_s24, 2 }
   0x8   : > { %s1073_s25 = sshll.u32 (!%p251_p3), %s1185_s18, 3  ;;  %p305_p5 = scmp.lt.s32.totalorder (!%p251_p3), %s1189_s19, 1 }
   0x9   : > { %s1685_s24 = smov (%p30_p4, %s1683_s24), 0  ;;  %254 = sbr.rel (%p251_p3) target bundleno = 418 (0x1a2), region = 36 }
   0xa   : > { %p307_p6 = scmp.lt.s32.totalorder (!%p251_p3), %s1073_s25, 15  ;;  %s1112_s6 = sadd.s32 (!%p251_p3), 8, %s1073_s25 }
   0xb   : > { %p1278_p7 = scmp.lt.s32.totalorder (!%p251_p3), %s1112_s6, 15  ;;  %s1203_s12 = smov (!%p251_p3), 8  }
   0xc   : > { %s1204_s13 = smov (!%p251_p3), 12   ;;  %s1205_s16 = smov (!%p251_p3), 4  }
   0xd   : > { %p366_p8 = scmp.ne.s32.totalorder (!%p251_p3), %s1185_s18, 1  ;;  %s1084_s9 = sshll.u32 (!%p251_p3), %s1189_s19, 1 }
   0xe   : > { %s1273_s26 = scalar_select %p305_p5, %s1189_s19, 1  ;;  %vm390_vm0 = vcmask 1046528   ;;  %v643_v48 = vld [vmem:[%s1671_s2 + $0x8] sm:$0xff]  ;;  %v642_v50 = vld [vmem:[%s1671_s2] sm:$0xff]  ;;  %vm591_vm1 = vcmask 31744   ;;  %vm608_vm2 = vcmask 64512  }
   0xf   : > { %s308_s27 = scalar_select %p307_p6, %s1073_s25, 15  ;;  %711 = vmatpush.msra.mxu0 %v643_v48  ;;  %1113 = vmatpush.msra.mxu1 %v643_v48  ;;  %vm625_vm3 = vcmask 97280   ;;  %vm648_vm4 = vcmask 130048   ;;  %vm810_vm6 = vcmask 261120  }
  0x10   : > { %s1075_s28 = sshll.u32 %s1273_s26, 5  ;;  %s1687_s6 = smov (!%p1278_p7, %s1112_s6), 15  ;;  %1114 = vmatpush.msra.mxu2 %v643_v48  ;;  %1115 = vmatpush.msra.mxu3 %v643_v48 }
  0x11   : > { %s1074_s29 = sshll.u32 %s308_s27, 1  ;;  %s1689_s6 = smov (!%p1278_p7, %s1687_s6), 15  ;;  %712 = vmatpush.msra.mxu0 %v642_v50  ;;  %1116 = vmatpush.msra.mxu1 %v642_v50 }
  0x12   : > { %s311_s30 = sadd.s32 %s1075_s28, %s1074_s29  ;;  %s1081_s14 = sshll.u32 %s1689_s6, 1  ;;  %1117 = vmatpush.msra.mxu2 %v642_v50  ;;  %1118 = vmatpush.msra.mxu3 %v642_v50 }
  0x13   : > { %s1076_s7 = sshll.u32 %s311_s30, 3  ;;  %s1324_s15 = sadd.s32 %s1081_s14, %s1075_s28 }
  0x14   : > { %s1285_s11 = scalar_lea.vmem %s1669_s0, %s1076_s7  ;;  %s1083_s29 = sshll.u32 %s1324_s15, 3 }
  0x15   : > { %v1288_v0 = vld [vmem:[%s1285_s11 + $0x10] sm:$0xff]  ;;  %v1291_v1 = vld [vmem:[%s1285_s11 + $0x18] sm:$0xff]  ;;  %v1294_v2 = vld [vmem:[%s1285_s11] sm:$0xff]  ;;  %s367_s28 = scalar_select %p366_p8, 1, 0 }
  0x16   : > { %494 = vrot.lane.b32.xlu0 %v1288_v0, %s1203_s12  ;;  %v394_v3 = vrot.slane %v1288_v0, 1  ;;  %v395_v4 = vrot.slane %v1291_v1, 1  ;;  %v1303_v5 = vld [vmem:[%s1285_s11 + $0x8] sm:$0xff]  ;;  %v391_v6 = vrot.slane %v1294_v2, 1  ;;  %496 = vrot.lane.b32.xlu2 %v1291_v1, %s1203_s12  ;;  %v1311_v9 = vld [vmem:[%s1285_s11 + $0x20] sm:$0xff]  ;;  %s327_s8 = scalar_lea.vmem %s1670_s1, %s1083_s29  ;;  %s1529_s10 = sadd.s32 %s1185_s18, %s1084_s9 }
  0x17   : > { %v392_v7 = vrot.slane %v1303_v5, 1  ;;  %v1314_v10 = vld [vmem:[%s1285_s11 + $0x28] sm:$0xff]  ;;  %v397_v11 = vrot.slane %v1311_v9, 1  ;;  %v1330_v16 = vld [vmem:[%s1285_s11 + $0x40] sm:$0xff]  ;;  %v1340_v20 = vld [vmem:[%s1285_s11 + $0x30] sm:$0xff]  ;;  %s368_s30 = scvt.s32.f32 %s367_s28  ;;  %p344_p10 = scmp.lt.s32.totalorder %s1529_s10, 3 }
  0x18   : > { %v396_v8 = vsel %vm390_vm0, %v394_v3, %v395_v4  ;;  %v398_v12 = vrot.slane %v1314_v10, 1  ;;  %v1333_v17 = vld [vmem:[%s1285_s11 + $0x48] sm:$0xff]  ;;  %v403_v18 = vrot.slane %v1330_v16, 1  ;;  %v1343_v21 = vld [vmem:[%s1285_s11 + $0x38] sm:$0xff]  ;;  %v424_v22 = vsel %vm390_vm0, %v395_v4, 0.0  ;;  %v1355_v27 = vld [vmem:[%s1285_s11 + $0x50] sm:$0xff] }
  0x19   : > { %543 = vrot.lane.b32.xlu1 %v396_v8, %s1204_s13  ;;  %v393_v13 = vsel %vm390_vm0, %v391_v6, %v392_v7  ;;  %v423_v15 = vsel %vm390_vm0, %v392_v7, 0.0  ;;  %v404_v19 = vrot.slane %v1333_v17, 1  ;;  %v1347_v23 = vld [vmem:[%s1285_s11 + $0x58] sm:$0xff]  ;;  %v400_v25 = vrot.slane %v1340_v20, 1  ;;  %v1368_v32 = vld [vmem:[%s1285_s11 + $0x60] sm:$0xff]  ;;  %v1371_v33 = vld [vmem:[%s1285_s11 + $0x68] sm:$0xff] }
  0x1a   : > { %v399_v14 = vsel %vm390_vm0, %v397_v11, %v398_v12  ;;  %v401_v26 = vrot.slane %v1343_v21, 1  ;;  %v406_v28 = vrot.slane %v1355_v27, 1  ;;  %v407_v29 = vrot.slane %v1347_v23, 1  ;;  %v1387_v39 = vld [vmem:[%s1285_s11 + $0x78] sm:$0xff]  ;;  %v1392_v41 = vld [vmem:[%s1285_s11 + $0x70] sm:$0xff]  ;;  %v369_v52 = vld [vmem:[%s327_s8] sm:$0xff] }
  0x1b   : > { %v405_v24 = vsel %vm390_vm0, %v403_v18, %v404_v19  ;;  %v425_v34 = vsel %vm390_vm0, %v398_v12, 0.0  ;;  %v409_v35 = vrot.slane %v1368_v32, 1  ;;  %v410_v36 = vrot.slane %v1371_v33, 1  ;;  %v370_v54 = vld [vmem:[%s327_s8 + $0x8] sm:$0xff]  ;;  %s1085_s11 = sshll.u32 %s1529_s10, 4  ;;  %s1693_s10 = smov (!%p344_p10, %s1529_s10), 3 }
  0x1c   : > { %v402_v30 = vsel %vm390_vm0, %v400_v25, %v401_v26  ;;  %v408_v31 = vsel %vm390_vm0, %v406_v28, %v407_v29  ;;  %v427_v38 = vsel %vm390_vm0, %v404_v19, 0.0  ;;  %v426_v40 = vsel %vm390_vm0, %v401_v26, 0.0  ;;  %p335_p9 = scmp.lt.s32.totalorder %s1085_s11, 63 }
  0x1d   : > { %v411_v37 = vsel %vm390_vm0, %v409_v35, %v410_v36  ;;  %v412_v42 = vrot.slane %v1392_v41, 1  ;;  %v413_v43 = vrot.slane %v1387_v39, 1  ;;  %v428_v45 = vsel %vm390_vm0, %v407_v29, 0.0 }
  0x1e   : > { %446 = vrot.lane.b32.xlu0 %v393_v13, %s1205_s16  ;;  %454 = vrot.lane.b32.xlu2 %v399_v14, %s1205_s16  ;;  %v429_v46 = vsel %vm390_vm0, %v410_v36, 0.0  ;;  %v371_v53 = vstv %s368_s30  ;;  %s1691_s11 = smov (!%p335_p9, %s1085_s11), 63 }
  0x1f   : > { %v414_v44 = vsel %vm390_vm0, %v412_v42, %v413_v43  ;;  %v430_v47 = vsel %vm390_vm0, %v413_v43, 0.0  ;;  %v372_v55 = vmul.f32 %v371_v53, %v369_v52  ;;  %v373_v56 = vmul.f32 %v371_v53, %v370_v54  ;;  %s1086_s19 = sshll.u32 %s1691_s11, 3 }
  0x20   : > { %s1544_s15 = scalar_lea.vmem %s1673_s4, %s1086_s19 }
  0x21   : > { %448 = vrot.lane.b32.xlu1 %v423_v15, %s1205_s16  ;;  %v433_v57 = vrot.slane %v372_v55, 1  ;;  %v434_v58 = vrot.slane %v373_v56, 1 }
  0x23   : > { %v435_v60 = vsel %vm390_vm0, %v433_v57, %v434_v58  ;;  %v437_v3 = vsel %vm390_vm0, %v434_v58, 0.0 }
  0x26   : > { %502 = vrot.lane.b32.xlu0 %v1340_v20, %s1203_s12  ;;  %545 = vrot.lane.b32.xlu2 %v424_v22, %s1204_s13 }
  0x29   : > { %462 = vrot.lane.b32.xlu1 %v405_v24, %s1205_s16 }
  0x2e   : > { %551 = vrot.lane.b32.xlu0 %v402_v30, %s1204_s13  ;;  %559 = vrot.lane.b32.xlu2 %v408_v31, %s1204_s13 }
  0x31   : > { %510 = vrot.lane.b32.xlu1 %v1355_v27, %s1203_s12 }
  0x36   : > { %450 = vrot.lane.b32.xlu0 %v396_v8, %s1205_s16  ;;  %498 = vrot.lane.b32.xlu2 %v1311_v9, %s1203_s12 }
  0x39   : > { %456 = vrot.lane.b32.xlu1 %v425_v34, %s1205_s16 }
  0x3e   : > { %504 = vrot.lane.b32.xlu0 %v1343_v21, %s1203_s12  ;;  %470 = vrot.lane.b32.xlu2 %v411_v37, %s1205_s16 }
  0x41   : > { %464 = vrot.lane.b32.xlu1 %v427_v38, %s1205_s16 }
  0x46   : > { %547 = vrot.lane.b32.xlu0 %v399_v14, %s1204_s13  ;;  %512 = vrot.lane.b32.xlu2 %v1347_v23, %s1203_s12 }
  0x49   : > { %553 = vrot.lane.b32.xlu1 %v426_v40, %s1204_s13 }
  0x4e   : > { %518 = vrot.lane.b32.xlu0 %v1392_v41, %s1203_s12  ;;  %567 = vrot.lane.b32.xlu2 %v414_v44, %s1204_s13 }
  0x51   : > { %561 = vrot.lane.b32.xlu1 %v428_v45, %s1204_s13 }
  0x56   : > { %452 = vrot.lane.b32.xlu0 %v424_v22, %s1205_s16  ;;  %500 = vrot.lane.b32.xlu2 %v1314_v10, %s1203_s12 }
  0x59   : > { %458 = vrot.lane.b32.xlu1 %v402_v30, %s1205_s16 }
  0x5e   : > { %506 = vrot.lane.b32.xlu0 %v1330_v16, %s1203_s12  ;;  %472 = vrot.lane.b32.xlu2 %v429_v46, %s1205_s16 }
  0x61   : > { %466 = vrot.lane.b32.xlu1 %v408_v31, %s1205_s16 }
  0x66   : > { %549 = vrot.lane.b32.xlu0 %v425_v34, %s1204_s13  ;;  %514 = vrot.lane.b32.xlu2 %v1368_v32, %s1203_s12 }
  0x69   : > { %555 = vrot.lane.b32.xlu1 %v405_v24, %s1204_s13 }
  0x6e   : > { %520 = vrot.lane.b32.xlu0 %v1387_v39, %s1203_s12  ;;  %569 = vrot.lane.b32.xlu2 %v430_v47, %s1204_s13 }
  0x70   : > { %v497_v49 = vpop.permute.xlu2 %496 }
  0x71   : > { %563 = vrot.lane.b32.xlu1 %v411_v37, %s1204_s13 }
  0x76   : > { %460 = vrot.lane.b32.xlu0 %v426_v40, %s1205_s16  ;;  %468 = vrot.lane.b32.xlu2 %v428_v45, %s1205_s16 }
  0x78   : > { %v455_v51 = vpop.permute.xlu2 %454 }
  0x79   : > { %508 = vrot.lane.b32.xlu1 %v1333_v17, %s1203_s12  ;;  %v596_v19 = vsel %vm591_vm1, %v1311_v9, %v455_v51 }
  0x7e   : > { %474 = vrot.lane.b32.xlu0 %v414_v44, %s1205_s16  ;;  %516 = vrot.lane.b32.xlu2 %v1371_v33, %s1203_s12 }
  0x80   : > { %v546_v59 = vpop.permute.xlu2 %545 }
  0x81   : > { %557 = vrot.lane.b32.xlu1 %v427_v38, %s1204_s13 }
  0x86   : > { %522 = vrot.lane.b32.xlu0 %v372_v55, %s1203_s12  ;;  %571 = vrot.lane.b32.xlu2 %v435_v60, %s1204_s13 }
  0x88   : > { %v495_v61 = vpop.permute.xlu0 %494  ;;  %v560_v63 = vpop.permute.xlu2 %559 }
  0x89   : > { %565 = vrot.lane.b32.xlu1 %v429_v46, %s1204_s13 }
  0x8b   : > { %v544_v62 = vpop.permute.xlu1 %543 }
  0x8e   : > { %476 = vrot.lane.b32.xlu0 %v430_v47, %s1205_s16  ;;  %573 = vrot.lane.b32.xlu2 %v437_v3, %s1204_s13  ;;  %s1088_s16 = sshll.u32 %s1693_s10, 1 }
  0x8f   : > { %s347_s26 = scalar_lea.vmem %s1674_s5, %s1088_s16 }
  0x90   : > { %v447_v4 = vpop.permute.xlu0 %446  ;;  %v499_v13 = vpop.permute.xlu2 %498 }
  0x91   : > { %v592_v6 = vsel %vm591_vm1, %v1294_v2, %v447_v4  ;;  %524 = vrot.lane.b32.xlu1 %v373_v56, %s1203_s12 }
  0x92   : > { %v609_v7 = vsel %vm608_vm2, %v592_v6, %v495_v61 }
  0x93   : > { %v449_v8 = vpop.permute.xlu1 %448  ;;  %v626_v11 = vsel %vm625_vm3, %v609_v7, %v544_v62 }
  0x94   : > { %1089 = vmatmul.msk.f32.vlgmr.msra.gmra.mxu0 %vm648_vm4, %v626_v11  ;;  %v593_v12 = vsel %vm591_vm1, %v1303_v5, %v449_v8 }
  0x95   : > { %v610_v15 = vsel %vm608_vm2, %v593_v12, %v497_v49 }
  0x96   : > { %v627_v2 = vsel %vm625_vm3, %v610_v15, %v546_v59 }
  0x98   : > { %v503_v14 = vpop.permute.xlu0 %502  ;;  %v471_v22 = vpop.permute.xlu2 %470 }
  0x99   : > { %v613_v24 = vsel %vm608_vm2, %v596_v19, %v503_v14 }
  0x9b   : > { %v463_v18 = vpop.permute.xlu1 %462 }
  0x9c   : > { %1090 = vmatmul.msk.f32.gmra.mxu0 %vm648_vm4, %v627_v2  ;;  %v600_v5 = vsel %vm591_vm1, %v1330_v16, %v463_v18 }
  0xa0   : > { %v552_v25 = vpop.permute.xlu0 %551  ;;  %v513_v9 = vpop.permute.xlu2 %512 }
  0xa1   : > { %v630_v26 = vsel %vm625_vm3, %v613_v24, %v552_v25 }
  0xa2   : > { %1093 = vmatmul.msk.f32.vlgmr.msra.gmra.mxu1 %vm648_vm4, %v630_v26 }
  0xa3   : > { %v511_v28 = vpop.permute.xlu1 %510 }
  0xa4   : > { %v617_v29 = vsel %vm608_vm2, %v600_v5, %v511_v28 }
  0xa5   : > { %v634_v30 = vsel %vm625_vm3, %v617_v29, %v560_v63 }
  0xa6   : > { %1097 = vmatmul.msk.f32.vlgmr.msra.gmra.mxu2 %vm648_vm4, %v634_v30 }
  0xa8   : > { %v451_v31 = vpop.permute.xlu0 %450  ;;  %v568_v37 = vpop.permute.xlu2 %567 }
  0xa9   : > { %v594_v38 = vsel %vm591_vm1, %v1288_v0, %v451_v31  ;;  %v604_v0 = vsel %vm591_vm1, %v1368_v32, %v471_v22 }
  0xaa   : > { %v611_v42 = vsel %vm608_vm2, %v594_v38, %v499_v13 }
  0xab   : > { %v457_v34 = vpop.permute.xlu1 %456 }
  0xac   : > { %v597_v43 = vsel %vm591_vm1, %v1314_v10, %v457_v34 }
  0xb0   : > { %v505_v35 = vpop.permute.xlu0 %504  ;;  %v501_v47 = vpop.permute.xlu2 %500 }
  0xb1   : > { %v614_v44 = vsel %vm608_vm2, %v597_v43, %v505_v35 }
  0xb3   : > { %v465_v36 = vpop.permute.xlu1 %464 }
  0xb4   : > { %v601_v48 = vsel %vm591_vm1, %v1333_v17, %v465_v36 }
  0xb5   : > { %v618_v51 = vsel %vm608_vm2, %v601_v48, %v513_v9 }
  0xb8   : > { %v548_v40 = vpop.permute.xlu0 %547  ;;  %v473_v54 = vpop.permute.xlu2 %472 }
  0xb9   : > { %v628_v16 = vsel %vm625_vm3, %v611_v42, %v548_v40  ;;  %v1538_v40 = vld [vmem:[%s1672_s3] ss:$0 sm:$0xff] }
  0xba   : > { %1091 = vmatmul.msk.f32.gmra.mxu0 %vm648_vm4, %v628_v16 }
  0xbb   : > { %v554_v45 = vpop.permute.xlu1 %553 }
  0xbc   : > { %v631_v46 = vsel %vm625_vm3, %v614_v44, %v554_v45 }
  0xbd   : > { %1094 = vmatmul.msk.f32.gmra.mxu1 %vm648_vm4, %v631_v46 }
  0xc0   : > { %v519_v49 = vpop.permute.xlu0 %518  ;;  %v515_v57 = vpop.permute.xlu2 %514 }
  0xc1   : > { %v621_v50 = vsel %vm608_vm2, %v604_v0, %v519_v49 }
  0xc2   : > { %v638_v10 = vsel %vm625_vm3, %v621_v50, %v568_v37 }
  0xc3   : > { %v562_v52 = vpop.permute.xlu1 %561  ;;  %1101 = vmatmul.msk.f32.vlgmr.msra.gmra.mxu3 %vm648_vm4, %v638_v10 }
  0xc4   : > { %v635_v53 = vsel %vm625_vm3, %v618_v51, %v562_v52 }
  0xc5   : > { %1098 = vmatmul.msk.f32.gmra.mxu2 %vm648_vm4, %v635_v53 }
  0xc8   : > { %v453_v55 = vpop.permute.xlu0 %452  ;;  %v570_v4 = vpop.permute.xlu2 %569 }
  0xc9   : > { %v595_v58 = vsel %vm591_vm1, %v1291_v1, %v453_v55  ;;  %v605_v1 = vsel %vm591_vm1, %v1371_v33, %v473_v54 }
  0xca   : > { %v612_v60 = vsel %vm608_vm2, %v595_v58, %v501_v47 }
  0xcb   : > { %v459_v32 = vpop.permute.xlu1 %458 }
  0xcc   : > { %v598_v62 = vsel %vm591_vm1, %v1340_v20, %v459_v32 }
  0xd0   : > { %v507_v56 = vpop.permute.xlu0 %506  ;;  %v469_v15 = vpop.permute.xlu2 %468 }
  0xd1   : > { %v615_v63 = vsel %vm608_vm2, %v598_v62, %v507_v56  ;;  %v603_v5 = vsel %vm591_vm1, %v1347_v23, %v469_v15 }
  0xd3   : > { %v467_v17 = vpop.permute.xlu1 %466 }
  0xd4   : > { %v602_v7 = vsel %vm591_vm1, %v1355_v27, %v467_v17 }
  0xd5   : > { %v619_v12 = vsel %vm608_vm2, %v602_v7, %v515_v57 }
  0xd8   : > { %v550_v59 = vpop.permute.xlu0 %549  ;;  %v517_v2 = vpop.permute.xlu2 %516 }
  0xd9   : > { %v629_v61 = vsel %vm625_vm3, %v612_v60, %v550_v59  ;;  %v620_v31 = vsel %vm608_vm2, %v603_v5, %v517_v2 }
  0xda   : > { %1092 = vmatmul.msk.f32.gmra.mxu0 %vm648_vm4, %v629_v61 }
  0xdb   : > { %v556_v3 = vpop.permute.xlu1 %555 }
  0xdc   : > { %v632_v6 = vsel %vm625_vm3, %v615_v63, %v556_v3 }
  0xdd   : > { %1095 = vmatmul.msk.f32.gmra.mxu1 %vm648_vm4, %v632_v6 }
  0xe0   : > { %v521_v8 = vpop.permute.xlu0 %520  ;;  %v572_v26 = vpop.permute.xlu2 %571 }
  0xe1   : > { %v622_v11 = vsel %vm608_vm2, %v605_v1, %v521_v8 }
  0xe2   : > { %v639_v20 = vsel %vm625_vm3, %v622_v11, %v570_v4 }
  0xe3   : > { %v564_v13 = vpop.permute.xlu1 %563  ;;  %1102 = vmatmul.msk.f32.gmra.mxu3 %vm648_vm4, %v639_v20 }
  0xe4   : > { %v636_v14 = vsel %vm625_vm3, %v619_v12, %v564_v13 }
  0xe5   : > { %1099 = vmatmul.msk.f32.gmra.mxu2 %vm648_vm4, %v636_v14 }
  0xe8   : > { %v461_v18 = vpop.permute.xlu0 %460 }
  0xe9   : > { %v599_v27 = vsel %vm591_vm1, %v1343_v21, %v461_v18 }
  0xeb   : > { %v509_v33 = vpop.permute.xlu1 %508 }
  0xec   : > { %v616_v22 = vsel %vm608_vm2, %v599_v27, %v509_v33 }
  0xf0   : > { %v475_v19 = vpop.permute.xlu0 %474 }
  0xf1   : > { %v606_v28 = vsel %vm591_vm1, %v1392_v41, %v475_v19  ;;  %v574_v41 = vpop.permute.xlu2 %573 }
  0xf3   : > { %v558_v24 = vpop.permute.xlu1 %557 }
  0xf4   : > { %v633_v25 = vsel %vm625_vm3, %v616_v22, %v558_v24 }
  0xf5   : > { %1096 = vmatmul.msk.f32.gmra.mxu1 %vm648_vm4, %v633_v25 }
  0xf8   : > { %v523_v29 = vpop.permute.xlu0 %522 }
  0xf9   : > { %v623_v21 = vsel %vm608_vm2, %v606_v28, %v523_v29 }
  0xfa   : > { %v640_v30 = vsel %vm625_vm3, %v623_v21, %v572_v26 }
  0xfb   : > { %v566_v9 = vpop.permute.xlu1 %565  ;;  %1103 = vmatmul.msk.f32.gmra.mxu3 %vm648_vm4, %v640_v30 }
  0xfc   : > { %v637_v34 = vsel %vm625_vm3, %v620_v31, %v566_v9 }
  0xfd   : > { %1100 = vmatmul.msk.f32.gmra.mxu2 %vm648_vm4, %v637_v34 }
 0x100   : > { %v477_v35 = vpop.permute.xlu0 %476 }
 0x101   : > { %v607_v23 = vsel %vm591_vm1, %v1387_v39, %v477_v35 }
 0x103   : > { %v525_v36 = vpop.permute.xlu1 %524 }
 0x104   : > { %v624_v37 = vsel %vm608_vm2, %v607_v23, %v525_v36 }
 0x105   : > { %v641_v38 = vsel %vm625_vm3, %v624_v37, %v574_v41 }
 0x106   : > { %1104 = vmatmul.msk.f32.gmra.mxu3 %vm648_vm4, %v641_v38 }
 0x111   : > { %v714_v39 = vpop.f32.mrf.mxu0 }
 0x112   : > { %v715_v42 = vadd.f32 %v1538_v40, %v714_v39 }
 0x114   : > { %vm762_vm5 = vcmp.ge.f32.partialorder %v715_v42, 0.0  ;;  %v778_v16 = vmul.f32 0.01, %v715_v42 }
 0x116   : > { %v794_v43 = vsel %vm762_vm5, %v715_v42, %v778_v16 }
 0x117   : > { %905 = vst.msk [vmem:[%s1544_s15] sm:$0xff] %vm810_vm6, %v794_v43  ;;  %v848_v47 = vmul.f32 %v794_v43, %v794_v43  ;;  %v811_v48 = vsel %vm810_vm6, %v794_v43, 0.0 }
 0x119   : > { %v717_v44 = vpop.f32.mrf.mxu0  ;;  %v864_v53 = vsel %vm810_vm6, %v848_v47, 0.0 }
 0x11a   : > { %v718_v45 = vadd.f32 %v1538_v40, %v717_v44 }
 0x11c   : > { %vm763_vm7 = vcmp.ge.f32.partialorder %v718_v45, 0.0  ;;  %v779_v46 = vmul.f32 0.01, %v718_v45 }
 0x11e   : > { %v795_v0 = vsel %vm763_vm7, %v718_v45, %v779_v46  ;;  %vm901_vm7 = vcmask 1040384  }
 0x11f   : > { %v812_v49 = vsel %vm810_vm6, %v795_v0, 0.0  ;;  %v849_v50 = vmul.f32 %v795_v0, %v795_v0  ;;  %906 = vst.msk [vmem:[%s1544_s15 + $0x8] sm:$0xff] %vm810_vm6, %v795_v0  ;;  %v726_v10 = vpop.f32.mrf.mxu1 }
 0x120   : > { %v813_v51 = vadd.f32 %v812_v49, %v811_v48  ;;  %v727_v52 = vadd.f32 %v1538_v40, %v726_v10 }
 0x121   : > { %v865_v54 = vsel %vm810_vm6, %v849_v50, 0.0 }
 0x122   : > { %v866_v55 = vadd.f32 %v865_v54, %v864_v53  ;;  %vm766_vm8 = vcmp.ge.f32.partialorder %v727_v52, 0.0  ;;  %v782_v32 = vmul.f32 0.01, %v727_v52 }
 0x124   : > { %v798_v56 = vsel %vm766_vm8, %v727_v52, %v782_v32 }
 0x125   : > { %909 = vst.msk [vmem:[%s1544_s15 + $0x20] sm:$0xff] %vm810_vm6, %v798_v56  ;;  %v852_v26 = vmul.f32 %v798_v56, %v798_v56  ;;  %v818_v34 = vsel %vm810_vm6, %v798_v56, 0.0 }
 0x127   : > { %v871_v37 = vsel %vm810_vm6, %v852_v26, 0.0 }
 0x129   : > { %v738_v57 = vpop.f32.mrf.mxu2 }
 0x12a   : > { %v739_v17 = vadd.f32 %v1538_v40, %v738_v57 }
 0x12c   : > { %vm770_vm9 = vcmp.ge.f32.partialorder %v739_v17, 0.0  ;;  %v786_v58 = vmul.f32 0.01, %v739_v17 }
 0x12e   : > { %v1559_v59 = vsel %vm770_vm9, %v739_v17, %v786_v58 }
 0x12f   : > { %913 = vst.msk [vmem:[%s1544_s15 + $0x40] sm:$0xff] %vm810_vm6, %v1559_v59  ;;  %v856_v57 = vmul.f32 %v1559_v59, %v1559_v59 }
 0x137   : > { %v720_v60 = vpop.f32.mrf.mxu0 }
 0x138   : > { %v721_v61 = vadd.f32 %v1538_v40, %v720_v60 }
 0x13a   : > { %vm764_vm10 = vcmp.ge.f32.partialorder %v721_v61, 0.0  ;;  %v780_v62 = vmul.f32 0.01, %v721_v61  ;;  %v729_v63 = vpop.f32.mrf.mxu1 }
 0x13b   : > { %v730_v3 = vadd.f32 %v1538_v40, %v729_v63  ;;  %v826_v63 = vsel %vm810_vm6, %v1559_v59, 0.0 }
 0x13c   : > { %v796_v4 = vsel %vm764_vm10, %v721_v61, %v780_v62 }
 0x13d   : > { %907 = vst.msk [vmem:[%s1544_s15 + $0x10] sm:$0xff] %vm810_vm6, %v796_v4  ;;  %vm767_vm11 = vcmp.ge.f32.partialorder %v730_v3, 0.0  ;;  %v783_v6 = vmul.f32 0.01, %v730_v3  ;;  %v850_v18 = vmul.f32 %v796_v4, %v796_v4  ;;  %v814_v27 = vsel %vm810_vm6, %v796_v4, 0.0 }
 0x13e   : > { %v815_v5 = vadd.f32 %v814_v27, %v813_v51 }
 0x13f   : > { %v799_v1 = vsel %vm767_vm11, %v730_v3, %v783_v6  ;;  %v867_v24 = vsel %vm810_vm6, %v850_v18, 0.0 }
 0x140   : > { %910 = vst.msk [vmem:[%s1544_s15 + $0x28] sm:$0xff] %vm810_vm6, %v799_v1  ;;  %v868_v31 = vadd.f32 %v867_v24, %v866_v55  ;;  %v853_v0 = vmul.f32 %v799_v1, %v799_v1  ;;  %v820_v48 = vsel %vm810_vm6, %v799_v1, 0.0  ;;  %v879_v1 = vsel %vm810_vm6, %v856_v57, 0.0 }
 0x142   : > { %v873_v51 = vsel %vm810_vm6, %v853_v0, 0.0 }
 0x146   : > { %v750_v7 = vpop.f32.mrf.mxu3 }
 0x147   : > { %v751_v8 = vadd.f32 %v1538_v40, %v750_v7 }
 0x148   : > { %v741_v11 = vpop.f32.mrf.mxu2 }
 0x149   : > { %vm774_vm12 = vcmp.ge.f32.partialorder %v751_v8, 0.0  ;;  %v790_v20 = vmul.f32 0.01, %v751_v8  ;;  %v742_v12 = vadd.f32 %v1538_v40, %v741_v11 }
 0x14b   : > { %v1572_v13 = vsel %vm774_vm12, %v751_v8, %v790_v20  ;;  %vm771_vm13 = vcmp.ge.f32.partialorder %v742_v12, 0.0  ;;  %v787_v14 = vmul.f32 0.01, %v742_v12 }
 0x14c   : > { %917 = vst.msk [vmem:[%s1544_s15 + $0x60] sm:$0xff] %vm810_vm6, %v1572_v13 }
 0x14d   : > { %v1577_v15 = vsel %vm771_vm13, %v742_v12, %v787_v14 }
 0x14e   : > { %914 = vst.msk [vmem:[%s1544_s15 + $0x48] sm:$0xff] %vm810_vm6, %v1577_v15  ;;  %v857_v8 = vmul.f32 %v1577_v15, %v1577_v15  ;;  %v828_v12 = vsel %vm810_vm6, %v1577_v15, 0.0 }
 0x157   : > { %v723_v33 = vpop.f32.mrf.mxu0 }
 0x158   : > { %v724_v2 = vadd.f32 %v1538_v40, %v723_v33 }
 0x15a   : > { %vm765_vm14 = vcmp.ge.f32.partialorder %v724_v2, 0.0  ;;  %v781_v19 = vmul.f32 0.01, %v724_v2  ;;  %v732_v22 = vpop.f32.mrf.mxu1 }
 0x15b   : > { %v733_v25 = vadd.f32 %v1538_v40, %v732_v22 }
 0x15c   : > { %v797_v28 = vsel %vm765_vm14, %v724_v2, %v781_v19  ;;  %v881_v2 = vsel %vm810_vm6, %v857_v8, 0.0 }
 0x15d   : > { %v816_v29 = vsel %vm810_vm6, %v797_v28, 0.0  ;;  %v851_v21 = vmul.f32 %v797_v28, %v797_v28  ;;  %908 = vst.msk [vmem:[%s1544_s15 + $0x18] sm:$0xff] %vm810_vm6, %v797_v28  ;;  %vm768_vm15 = vcmp.ge.f32.partialorder %v733_v25, 0.0  ;;  %v784_v30 = vmul.f32 0.01, %v733_v25 }
 0x15e   : > { %v817_v9 = vadd.f32 %v816_v29, %v815_v5  ;;  %v860_v5 = vmul.f32 %v1572_v13, %v1572_v13 }
 0x15f   : > { %v869_v35 = vsel %vm810_vm6, %v851_v21, 0.0  ;;  %v800_v23 = vsel %vm768_vm15, %v733_v25, %v784_v30 }
 0x160   : > { %v819_v41 = vadd.f32 %v818_v34, %v817_v9  ;;  %v870_v36 = vadd.f32 %v869_v35, %v868_v31  ;;  %911 = vst.msk [vmem:[%s1544_s15 + $0x30] sm:$0xff] %vm810_vm6, %v800_v23  ;;  %v854_v52 = vmul.f32 %v800_v23, %v800_v23  ;;  %v822_v55 = vsel %vm810_vm6, %v800_v23, 0.0 }
 0x161   : > { %v834_v9 = vsel %vm810_vm6, %v1572_v13, 0.0 }
 0x162   : > { %v872_v38 = vadd.f32 %v871_v37, %v870_v36  ;;  %v821_v50 = vadd.f32 %v820_v48, %v819_v41  ;;  %v875_v17 = vsel %vm810_vm6, %v854_v52, 0.0  ;;  %v887_v37 = vsel %vm810_vm6, %v860_v5, 0.0 }
 0x164   : > { %v874_v53 = vadd.f32 %v873_v51, %v872_v38  ;;  %v823_v32 = vadd.f32 %v822_v55, %v821_v50 }
 0x166   : > { %v753_v39 = vpop.f32.mrf.mxu3  ;;  %v876_v61 = vadd.f32 %v875_v17, %v874_v53 }
 0x167   : > { %v754_v42 = vadd.f32 %v1538_v40, %v753_v39 }
 0x168   : > { %v744_v16 = vpop.f32.mrf.mxu2 }
 0x169   : > { %vm775_vm0 = vcmp.ge.f32.partialorder %v754_v42, 0.0  ;;  %v791_v43 = vmul.f32 0.01, %v754_v42  ;;  %v745_v44 = vadd.f32 %v1538_v40, %v744_v16 }
 0x16b   : > { %v1596_v45 = vsel %vm775_vm0, %v754_v42, %v791_v43  ;;  %vm772_vm1 = vcmp.ge.f32.partialorder %v745_v44, 0.0  ;;  %v788_v46 = vmul.f32 0.01, %v745_v44 }
 0x16c   : > { %918 = vst.msk [vmem:[%s1544_s15 + $0x68] sm:$0xff] %vm810_vm6, %v1596_v45  ;;  %v861_v34 = vmul.f32 %v1596_v45, %v1596_v45  ;;  %v836_v38 = vsel %vm810_vm6, %v1596_v45, 0.0 }
 0x16d   : > { %v804_v47 = vsel %vm772_vm1, %v745_v44, %v788_v46 }
 0x16e   : > { %915 = vst.msk [vmem:[%s1544_s15 + $0x50] sm:$0xff] %vm810_vm6, %v804_v47  ;;  %v858_v27 = vmul.f32 %v804_v47, %v804_v47  ;;  %v830_v25 = vsel %vm810_vm6, %v804_v47, 0.0  ;;  %v889_v13 = vsel %vm810_vm6, %v861_v34, 0.0 }
 0x170   : > { %v883_v28 = vsel %vm810_vm6, %v858_v27, 0.0 }
 0x172   : > { %v735_v49 = vpop.f32.mrf.mxu1 }
 0x173   : > { %v736_v10 = vadd.f32 %v1538_v40, %v735_v49 }
 0x175   : > { %vm769_vm2 = vcmp.ge.f32.partialorder %v736_v10, 0.0  ;;  %v785_v54 = vmul.f32 0.01, %v736_v10 }
 0x177   : > { %v801_v56 = vsel %vm769_vm2, %v736_v10, %v785_v54 }
 0x178   : > { %v824_v58 = vsel %vm810_vm6, %v801_v56, 0.0  ;;  %v855_v60 = vmul.f32 %v801_v56, %v801_v56  ;;  %912 = vst.msk [vmem:[%s1544_s15 + $0x38] sm:$0xff] %vm810_vm6, %v801_v56 }
 0x179   : > { %v825_v62 = vadd.f32 %v824_v58, %v823_v32 }
 0x17a   : > { %v877_v3 = vsel %vm810_vm6, %v855_v60, 0.0 }
 0x17b   : > { %v827_v4 = vadd.f32 %v826_v63, %v825_v62  ;;  %v878_v6 = vadd.f32 %v877_v3, %v876_v61 }
 0x17d   : > { %v880_v7 = vadd.f32 %v879_v1, %v878_v6  ;;  %v829_v33 = vadd.f32 %v828_v12, %v827_v4 }
 0x17e   : > { %v756_v11 = vpop.f32.mrf.mxu3 }
 0x17f   : > { %v757_v20 = vadd.f32 %v1538_v40, %v756_v11  ;;  %v882_v24 = vadd.f32 %v881_v2, %v880_v7  ;;  %v831_v15 = vadd.f32 %v830_v25, %v829_v33 }
 0x180   : > { %v747_v14 = vpop.f32.mrf.mxu2 }
 0x181   : > { %vm776_vm3 = vcmp.ge.f32.partialorder %v757_v20, 0.0  ;;  %v792_v59 = vmul.f32 0.01, %v757_v20  ;;  %v748_v18 = vadd.f32 %v1538_v40, %v747_v14  ;;  %v884_v31 = vadd.f32 %v883_v28, %v882_v24 }
 0x183   : > { %v808_v19 = vsel %vm776_vm3, %v757_v20, %v792_v59  ;;  %vm773_vm4 = vcmp.ge.f32.partialorder %v748_v18, 0.0  ;;  %v789_v22 = vmul.f32 0.01, %v748_v18 }
 0x184   : > { %919 = vst.msk [vmem:[%s1544_s15 + $0x70] sm:$0xff] %vm810_vm6, %v808_v19  ;;  %v862_v39 = vmul.f32 %v808_v19, %v808_v19  ;;  %v838_v44 = vsel %vm810_vm6, %v808_v19, 0.0 }
 0x185   : > { %v805_v26 = vsel %vm773_vm4, %v748_v18, %v789_v22 }
 0x186   : > { %v832_v29 = vsel %vm810_vm6, %v805_v26, 0.0  ;;  %v859_v21 = vmul.f32 %v805_v26, %v805_v26  ;;  %916 = vst.msk [vmem:[%s1544_s15 + $0x58] sm:$0xff] %vm810_vm6, %v805_v26  ;;  %v891_v48 = vsel %vm810_vm6, %v862_v39, 0.0 }
 0x187   : > { %v833_v30 = vadd.f32 %v832_v29, %v831_v15 }
 0x188   : > { %v885_v35 = vsel %vm810_vm6, %v859_v21, 0.0 }
 0x189   : > { %v835_v23 = vadd.f32 %v834_v9, %v833_v30  ;;  %v886_v41 = vadd.f32 %v885_v35, %v884_v31  ;;  %v759_v36 = vpop.f32.mrf.mxu3 }
 0x18a   : > { %v760_v42 = vadd.f32 %v1538_v40, %v759_v36 }
 0x18b   : > { %v888_v16 = vadd.f32 %v887_v37, %v886_v41  ;;  %v837_v43 = vadd.f32 %v836_v38, %v835_v23 }
 0x18c   : > { %vm777_vm5 = vcmp.ge.f32.partialorder %v760_v42, 0.0  ;;  %v793_v46 = vmul.f32 0.01, %v760_v42 }
 0x18d   : > { %v839_v47 = vadd.f32 %v838_v44, %v837_v43  ;;  %v890_v0 = vadd.f32 %v889_v13, %v888_v16 }
 0x18e   : > { %v809_v49 = vsel %vm777_vm5, %v760_v42, %v793_v46 }
 0x18f   : > { %v840_v45 = vsel %vm810_vm6, %v809_v49, 0.0  ;;  %v863_v50 = vmul.f32 %v809_v49, %v809_v49  ;;  %v892_v10 = vadd.f32 %v891_v48, %v890_v0  ;;  %920 = vst.msk [vmem:[%s1544_s15 + $0x78] sm:$0xff] %vm810_vm6, %v809_v49 }
 0x190   : > { %v841_v40 = vadd.f32 %v840_v45, %v839_v47 }
 0x191   : > { %v893_v51 = vsel %vm810_vm6, %v863_v50, 0.0  ;;  %vm903_vm6 = vcmask 254976  }
 0x192   : > { %v842_v52 = vrot.slane %v841_v40, 4  ;;  %v894_v53 = vadd.f32 %v893_v51, %v892_v10 }
 0x194   : > { %v843_v54 = vadd.f32 %v842_v52, %v841_v40  ;;  %v895_v55 = vrot.slane %v894_v53, 4 }
 0x196   : > { %v844_v32 = vrot.slane %v843_v54, 2  ;;  %v896_v56 = vadd.f32 %v895_v55, %v894_v53 }
 0x198   : > { %v845_v57 = vadd.f32 %v844_v32, %v843_v54  ;;  %v897_v17 = vrot.slane %v896_v56, 2 }
 0x19a   : > { %v846_v58 = vrot.slane %v845_v57, 1  ;;  %v898_v60 = vadd.f32 %v897_v17, %v896_v56 }
 0x19c   : > { %v899_v61 = vrot.slane %v898_v60, 1  ;;  %v847_v62 = vadd.f32 %v846_v58, %v845_v57 }
 0x19e   : > { %v900_v63 = vadd.f32 %v899_v61, %v898_v60 }
 0x1a0   : > { %v902_v3 = vsel %vm901_vm7, %v847_v62, %v900_v63 }
 0x1a1   : > { %904 = vst.msk [vmem:[%s347_s26] sm:$0x3] %vm903_vm6, %v902_v3 }
 0x1a2 PF: > { %s16_s22 = sadd.s32 1, %s1201_s22   ;;  %s1676_s18 = smov %s1193_s20 }
 0x1a3   : > { %p13_p11 = scmp.ge.s32.totalorder %s16_s22, 6   ;;  %s1677_s19 = smov %s1197_s21 }
 0x1a4   : > { %s1678_s20 = smov %s1681_s23  ;;  %s1679_s21 = smov %s1685_s24 }
 0x1a5   :  { %15 = sbr.rel (!%p13_p11) target bundleno = 3 (0x3), region = 81 }

</bundles_post_ra>
